<compile_context>
chip_gen: v5e
topology: v5e:2x2
jax: 0.10.0
libtpu: 0.0.40
codegen_flags: <defaults>
</compile_context>

<pallas_src>
import functools

import jax
import jax.numpy as jnp
import numpy as np
from jax import lax
from jax.experimental import pallas as pl
from jax.experimental.pallas import tpu as pltpu


def _round_up(x, m):
    return ((x + m - 1) // m) * m


def _sublane(dtype):
    # Sublane granule for the second-to-last dim: 8 for f32, 16 for bf16, 32 for i8/fp8.
    return max(8, 32 // jnp.dtype(dtype).itemsize)


def _vmem_capacity_bytes():
    try:
        info = pltpu.get_tpu_info()
        for attr in ("vmem_capacity_bytes", "vmem_size_bytes", "vmem_bytes"):
            v = getattr(info, attr, None)
            if v:
                return int(v)
    except Exception:
        pass
    return 64 * 1024 * 1024  # conservative: v7x per-TC VMEM


def _default_config():
    vmem = _vmem_capacity_bytes()
    if vmem >= 100 * 1024 * 1024:
        # v5e / v6e: 128 MiB physical VMEM -> big tiles, ~96 MiB scoped limit.
        return dict(tm=1024, tn=2048, tk=1024, vmem_limit=96 * 1024 * 1024)
    # v7x: 64 MiB per TC -> keep the double-buffered working set < ~48 MiB.
    return dict(tm=512, tn=1024, tk=1024, vmem_limit=48 * 1024 * 1024)


def _pad_to(a, shape):
    """Zero-pad only if needed (avoids a full HBM copy in the common case)."""
    pads = tuple((0, t - s) for s, t in zip(a.shape, shape))
    if any(p[1] for p in pads):
        a = jnp.pad(a, pads)
    return a


# Contract the last dim of both operands -> feeds the MXU directly.
_DN = (((1,), (1,)), ((), ()))


def _lora_down_kernel(x_ref, wd_ref, down_ref, acc_ref, *, scale):
    """Pre-pass: down = (x @ Wd.T) * scale, accumulated over K tiles."""
    k = pl.program_id(1)

    @pl.when(k == 0)
    def _():
        acc_ref[...] = jnp.zeros_like(acc_ref)

    acc_ref[...] += lax.dot_general(
        x_ref[...], wd_ref[...], dimension_numbers=_DN,
        preferred_element_type=jnp.float32)

    @pl.when(k == pl.num_programs(1) - 1)
    def _():
        down_ref[...] = (acc_ref[...] * scale).astype(down_ref.dtype)


def _lora_linear_kernel(x_ref, w_ref, down_ref, wu_ref, o_ref, acc_ref):
    """Main pass: o = x @ W.T + down @ Wu.T  (scale already folded into down)."""
    k = pl.program_id(2)

    @pl.when(k == 0)
    def _():
        acc_ref[...] = jnp.zeros_like(acc_ref)

    acc_ref[...] += lax.dot_general(
        x_ref[...], w_ref[...], dimension_numbers=_DN,
        preferred_element_type=jnp.float32)

    @pl.when(k == pl.num_programs(2) - 1)
    def _():
        up = lax.dot_general(
            down_ref[...], wu_ref[...], dimension_numbers=_DN,
            preferred_element_type=jnp.float32)
        # Combine in f32, single cast at the (lane-dense) store.
        o_ref[...] = (acc_ref[...] + up).astype(o_ref.dtype)


def lora_injected_linear(x, w_linear, w_down, w_up, *, scale=1.0,
                         tm=None, tn=None, tk=None, mxu_dtype=None):
    """x: (..., in_features) -> (..., out_features).

    w_linear: (out, in)   -- nn.Linear weight (bias=False, module default)
    w_down:   (r, in)     -- lora_down weight
    w_up:     (out, r)    -- lora_up weight
    mxu_dtype: optional dtype for MXU operands (e.g. jnp.bfloat16); accumulation
               stays f32 and the output keeps x.dtype.
    """
    cfg = _default_config()
    tm = cfg["tm"] if tm is None else tm
    tn = cfg["tn"] if tn is None else tn
    tk = cfg["tk"] if tk is None else tk
    vmem_limit = cfg["vmem_limit"]

    in_features = x.shape[-1]
    out_features = w_linear.shape[0]
    r = w_down.shape[0]
    lead = x.shape[:-1]
    out_dtype = x.dtype
    compute_dtype = x.dtype if mxu_dtype is None else jnp.dtype(mxu_dtype)

    x2d = x.reshape(-1, in_features)
    m = x2d.shape[0]

    # Effective tiles: cap at the (padded) problem size, respect sublane/lane tiling.
    sub = _sublane(compute_dtype)
    tm_eff = min(tm, _round_up(m, sub))
    tk_eff = min(tk, _round_up(in_features, 128))
    tn_eff = min(tn, _round_up(out_features, 128))
    r_pad = _round_up(max(r, 1), 128)          # lane-dense LoRA rank

    m_pad = _round_up(m, tm_eff)
    k_pad = _round_up(in_features, tk_eff)
    n_pad = _round_up(out_features, tn_eff)

    # Cast (no-op if dtype already matches) and pad only where required.
    x_p = _pad_to(x2d.astype(compute_dtype), (m_pad, k_pad))
    w_p = _pad_to(w_linear.astype(compute_dtype), (n_pad, k_pad))
    wd_p = _pad_to(w_down.astype(compute_dtype), (r_pad, k_pad))
    wu_p = _pad_to(w_up.astype(compute_dtype), (n_pad, r_pad))

    # ---- Pre-pass: down = (x @ Wd.T) * scale  (tiny: M*K*r FLOPs) ----
    down = pl.pallas_call(
        functools.partial(_lora_down_kernel, scale=float(scale)),
        out_shape=jax.ShapeDtypeStruct((m_pad, r_pad), compute_dtype),
        grid_spec=pltpu.PrefetchScalarGridSpec(
            num_scalar_prefetch=0,
            grid=(m_pad // tm_eff, k_pad // tk_eff),
            in_specs=[
                pl.BlockSpec((tm_eff, tk_eff), lambda i, k: (i, k)),
                pl.BlockSpec((r_pad, tk_eff), lambda i, k: (0, k)),
            ],
            out_specs=pl.BlockSpec((tm_eff, r_pad), lambda i, k: (i, 0)),
            scratch_shapes=[pltpu.VMEM((tm_eff, r_pad), jnp.float32)],
        ),
        compiler_params=pltpu.CompilerParams(
            dimension_semantics=("parallel", "arbitrary"),
            vmem_limit_bytes=vmem_limit,
        ),
    )(x_p, wd_p)

    # ---- Main pass: o = x @ W.T + down @ Wu.T ----
    grid = (m_pad // tm_eff, n_pad // tn_eff, k_pad // tk_eff)
    out_p = pl.pallas_call(
        _lora_linear_kernel,
        out_shape=jax.ShapeDtypeStruct((m_pad, n_pad), out_dtype),
        grid_spec=pltpu.PrefetchScalarGridSpec(
            num_scalar_prefetch=0,
            grid=grid,
            in_specs=[
                # x: depends on (i, k)
                pl.BlockSpec((tm_eff, tk_eff), lambda i, j, k: (i, k)),
                # W: depends on (j, k); re-streamed once per i -> maximize tm
                pl.BlockSpec((tn_eff, tk_eff), lambda i, j, k: (j, k)),
                # down: depends on i only
                pl.BlockSpec((tm_eff, r_pad), lambda i, j, k: (i, 0)),
                # Wu: depends on j only
                pl.BlockSpec((tn_eff, r_pad), lambda i, j, k: (j, 0)),
            ],
            out_specs=pl.BlockSpec((tm_eff, tn_eff), lambda i, j, k: (i, j)),
            scratch_shapes=[pltpu.VMEM((tm_eff, tn_eff), jnp.float32)],
        ),
        compiler_params=pltpu.CompilerParams(
            dimension_semantics=("parallel", "parallel", "arbitrary"),
            vmem_limit_bytes=vmem_limit,
        ),
    )(x_p, w_p, down, wu_p)

    out2d = out_p[:m, :out_features]
    return out2d.reshape(*lead, out_features)


def _reference(x, w_linear, w_down, w_up, *, scale=1.0):
    base = jnp.einsum("...i,oi->...o", x, w_linear)
    down = jnp.einsum("...i,ri->...r", x, w_down)
    up = jnp.einsum("...r,or->...o", down, w_up)
    return base + up * scale


if __name__ == "__main__":
    # --- Module-default config at small shapes: bias=False, r=4, scale=1.0 ---
    in_features, out_features, r = 32, 32, 4
    scale = 1.0
    batch, seq = 2, 8

    key = jax.random.PRNGKey(0)
    kx, kw, kd, ku = jax.random.split(key, 4)

    x = jax.random.normal(kx, (batch, seq, in_features), dtype=jnp.float32)
    # nn.Linear(in, out, bias=False).weight -> (out, in)
    w_linear = jax.random.normal(kw, (out_features, in_features),
                                 dtype=jnp.float32) * (1.0 / np.sqrt(in_features))
    # lora_down: (r, in), normal std = 1/r
    w_down = jax.random.normal(kd, (r, in_features), dtype=jnp.float32) * (1.0 / r)
    # lora_up: (out, r). Module inits to zeros; use a deterministic nonzero init
    # so the LoRA path is exercised numerically.
    w_up = jax.random.normal(ku, (out_features, r), dtype=jnp.float32) * 0.02

    out = lora_injected_linear(x, w_linear, w_down, w_up, scale=scale)
    out = jax.block_until_ready(out)
    ref = _reference(x, w_linear, w_down, w_up, scale=scale)
    np.testing.assert_allclose(np.asarray(out), np.asarray(ref),
                               rtol=1e-5, atol=1e-5)

    # --- Larger case exercising a real (3, 3, 3) grid, K accumulators,
    #     weight residency, and padding/slicing logic. ---
    m2, in2, out2 = 48, 280, 272
    k2 = jax.random.PRNGKey(1)
    ka, kb, kc, kd2 = jax.random.split(k2, 4)
    x2 = jax.random.normal(ka, (m2, in2), dtype=jnp.float32)
    wl2 = jax.random.normal(kb, (out2, in2), dtype=jnp.float32) * 0.05
    wd2 = jax.random.normal(kc, (r, in2), dtype=jnp.float32) * 0.25
    wu2 = jax.random.normal(kd2, (out2, r), dtype=jnp.float32) * 0.02

    out_big = lora_injected_linear(x2, wl2, wd2, wu2, scale=0.5,
                                   tm=16, tn=128, tk=128)
    out_big = jax.block_until_ready(out_big)
    ref_big = _reference(x2, wl2, wd2, wu2, scale=0.5)
    np.testing.assert_allclose(np.asarray(out_big), np.asarray(ref_big),
                               rtol=1e-4, atol=1e-4)

    # --- bf16 MXU-operand path (f32 accumulation), looser tolerance. ---
    out_bf16 = lora_injected_linear(x, w_linear, w_down, w_up, scale=scale,
                                    mxu_dtype=jnp.bfloat16)
    out_bf16 = jax.block_until_ready(out_bf16)
    np.testing.assert_allclose(np.asarray(out_bf16), np.asarray(ref),
                               rtol=5e-2, atol=5e-2)

    print("KERNEL_OK")
</pallas_src>

<mosaic_0001>
module attributes {stable_mosaic.version = 11 : i64} {
  func.func @_lora_down_kernel(%arg0: i32, %arg1: i32, %arg2: memref<16x128xf32, #tpu.memory_space<vmem>>, %arg3: memref<128x128xf32, #tpu.memory_space<vmem>>, %arg4: memref<16x128xf32, #tpu.memory_space<vmem>>, %arg5: memref<16x128xf32, #tpu.memory_space<vmem>>) attributes {dimension_semantics = [#tpu.dimension_semantics<parallel>, #tpu.dimension_semantics<arbitrary>], iteration_bounds = array<i64: 1, 1>, scalar_prefetch = 0 : i64, scratch_operands = 1 : i64, tpu.core_type = #tpu.core_type<tc>, window_params = [{transform_indices = @transform_0, window_bounds = array<i64: 16, 128>}, {transform_indices = @transform_1, window_bounds = array<i64: 128, 128>}, {transform_indices = @transform_2, window_bounds = array<i64: 16, 128>}]} {
    %c0_i32 = arith.constant 0 : i32
    %0 = arith.cmpi eq, %arg1, %c0_i32 : i32
    %1 = arith.extui %0 : i1 to i32
    %c0_i32_0 = arith.constant 0 : i32
    %2 = arith.cmpi ne, %1, %c0_i32_0 : i32
    scf.if %2 {
      %cst_10 = arith.constant 0.000000e+00 : f32
      %12 = vector.broadcast %cst_10 : f32 to vector<16x128xf32>
      %c0_11 = arith.constant 0 : index
      %c0_12 = arith.constant 0 : index
      %13 = vector.load %arg5[%c0_11, %c0_12] : memref<16x128xf32, #tpu.memory_space<vmem>>, vector<16x128xf32>
      tpu.vector_store %arg5[%c0_11, %c0_12], %12 {strides = array<i32>} : memref<16x128xf32, #tpu.memory_space<vmem>>, vector<16x128xf32>,
    } else {
    }
    %c0 = arith.constant 0 : index
    %c0_1 = arith.constant 0 : index
    %3 = vector.load %arg5[%c0, %c0_1] : memref<16x128xf32, #tpu.memory_space<vmem>>, vector<16x128xf32>
    %c0_2 = arith.constant 0 : index
    %c0_3 = arith.constant 0 : index
    %4 = vector.load %arg2[%c0_2, %c0_3] : memref<16x128xf32, #tpu.memory_space<vmem>>, vector<16x128xf32>
    %c0_4 = arith.constant 0 : index
    %c0_5 = arith.constant 0 : index
    %5 = vector.load %arg3[%c0_4, %c0_5] : memref<128x128xf32, #tpu.memory_space<vmem>>, vector<128x128xf32>
    %cst = arith.constant dense<0.000000e+00> : vector<16x128xf32>
    %6 = tpu.matmul %4, %5, %cst {dimension_numbers = #tpu.dot_dimension_numbers<[1], [1], [0], [0], [0, 0, 1, 0], [], []>} : vector<16x128xf32>, vector<128x128xf32>, vector<16x128xf32> -> vector<16x128xf32>
    %7 = arith.addf %3, %6 : vector<16x128xf32>
    %c0_6 = arith.constant 0 : index
    %c0_7 = arith.constant 0 : index
    %8 = vector.load %arg5[%c0_6, %c0_7] : memref<16x128xf32, #tpu.memory_space<vmem>>, vector<16x128xf32>
    tpu.vector_store %arg5[%c0_6, %c0_7], %7 {strides = array<i32>} : memref<16x128xf32, #tpu.memory_space<vmem>>, vector<16x128xf32>,
    %c0_i32_8 = arith.constant 0 : i32
    %9 = arith.cmpi eq, %arg1, %c0_i32_8 : i32
    %10 = arith.extui %9 : i1 to i32
    %c0_i32_9 = arith.constant 0 : i32
    %11 = arith.cmpi ne, %10, %c0_i32_9 : i32
    scf.if %11 {
      %c0_10 = arith.constant 0 : index
      %c0_11 = arith.constant 0 : index
      %12 = vector.load %arg5[%c0_10, %c0_11] : memref<16x128xf32, #tpu.memory_space<vmem>>, vector<16x128xf32>
      %cst_12 = arith.constant 1.000000e+00 : f32
      %13 = vector.broadcast %cst_12 : f32 to vector<16x128xf32>
      %14 = arith.mulf %12, %13 : vector<16x128xf32>
      %c0_13 = arith.constant 0 : index
      %c0_14 = arith.constant 0 : index
      %15 = vector.load %arg4[%c0_13, %c0_14] : memref<16x128xf32, #tpu.memory_space<vmem>>, vector<16x128xf32>
      tpu.vector_store %arg4[%c0_13, %c0_14], %14 {strides = array<i32>} : memref<16x128xf32, #tpu.memory_space<vmem>>, vector<16x128xf32>,
    } else {
    }
    return
  }
  func.func @transform_0(%arg0: i32, %arg1: i32) -> (i32, i32) {
    %c0_i32 = arith.constant 0 : i32
    return %arg0, %arg1 : i32, i32
  }
  func.func @transform_1(%arg0: i32, %arg1: i32) -> (i32, i32) {
    %c0_i32 = arith.constant 0 : i32
    %c0_i32_0 = arith.constant 0 : i32
    return %c0_i32, %arg1 : i32, i32
  }
  func.func @transform_2(%arg0: i32, %arg1: i32) -> (i32, i32) {
    %c0_i32 = arith.constant 0 : i32
    %c0_i32_0 = arith.constant 0 : i32
    return %arg0, %c0_i32 : i32, i32
  }
}

</mosaic_0001>

<bundles_post_ra>
// kernel: tpu_custom_call.1
= control target key start
LH: loop header
LB: loop body
LE: loop exit
PB: predicated region body
PF: predicated region fallthrough
CT: control target
= control target key end

     0   :  { %7 = vsyncpa [#allocation4], 0  ;;  %s261_s0 = inlined_call_operand.hbm [shape: f32[16,128], index: 0, kind: input, shape index: {}]   ;;  %s262_s1 = inlined_call_operand.hbm [shape: f32[128,128], index: 1, kind: input, shape index: {}]   ;;  %s263_s2 = inlined_call_operand.hbm [shape: f32[16,128], index: 2, kind: output, shape index: {}]  }
   0x1   :  { %8 = vsyncpa [#allocation7], 0 }
   0x2   :  { %9 = vsyncpa [#allocation5], 0  ;;  %s14_s11 = sshll.u32 %s261_s0, 4  ;;  %s223_s12 = smov [#allocation3]   ;;  %s15_s11 = int_to_ptr.hbm [resolvable:$true] %s14_s11 }
   0x3   :  { %s16_s13 = sshll.u32 %s223_s12, 4  ;;  %s27_s16 = sshll.u32 %s262_s1, 4  ;;  %s17_s13 = int_to_ptr.vmem [resolvable:$true] %s16_s13  ;;  %s28_s16 = int_to_ptr.hbm [resolvable:$true] %s27_s16 }
   0x4   :  { %s224_s17 = smov 128   ;;  %s225_s18 = smov 8  }
   0x5   :  { %22 = dma.hbm_to_vmem [thread:$0]  %s15_s11, 256, %s17_s13, [#allocation4], %s224_s17, %s224_s17, %s225_s18  }
   0x6   :  { %s226_s19 = smov [#allocation6]  }
   0x7   :  { %s29_s20 = sshll.u32 %s226_s19, 4  ;;  %s30_s20 = int_to_ptr.vmem [resolvable:$true] %s29_s20 }
   0x8   :  { %35 = dma.hbm_to_vmem [thread:$0]  %s28_s16, 2048, %s30_s20, [#allocation7], %s224_s17, %s224_s17, %s225_s18  }
   0x9   :  { %217 = dma.done.wait [#allocation4], 256  }
   0xa   :  { %218 = vsyncadd [#allocation4], 4294967040 }
   0xb   :  { %219 = dma.done.wait [#allocation7], 2048  }
   0xc   :  { %220 = vsyncadd [#allocation7], 4294965248  ;;  %v69_v0 = vld [vmem:[#allocation6 + $0x78] sm:$0xff]  ;;  %v68_v1 = vld [vmem:[#allocation6 + $0x70] sm:$0xff]  ;;  %s227_s0 = smov [#allocation8]   ;;  %s110_s23 = sshll.u32 %s263_s2, 4  ;;  %s111_s23 = int_to_ptr.hbm [resolvable:$true] %s110_s23 }
   0xd   :  { %70 = vmatpush.xpose.msra.mxu0 %v69_v0  ;;  %124 = vmatpush.xpose.msra.mxu1 %v69_v0  ;;  %v67_v2 = vld [vmem:[#allocation6 + $0x68] sm:$0xff]  ;;  %v66_v3 = vld [vmem:[#allocation6 + $0x60] sm:$0xff]  ;;  %v65_v4 = vld [vmem:[#allocation6 + $0x58] sm:$0xff]  ;;  %s108_s1 = sshll.u32 %s227_s0, 4  ;;  %s109_s1 = int_to_ptr.vmem [resolvable:$true] %s108_s1 }
   0xe   :  { %v64_v5 = vld [vmem:[#allocation6 + $0x50] sm:$0xff]  ;;  %v63_v6 = vld [vmem:[#allocation6 + $0x48] sm:$0xff]  ;;  %v62_v7 = vld [vmem:[#allocation6 + $0x40] sm:$0xff] }
   0xf   :  { %v61_v8 = vld [vmem:[#allocation6 + $0x38] sm:$0xff]  ;;  %v60_v9 = vld [vmem:[#allocation6 + $0x30] sm:$0xff]  ;;  %v59_v10 = vld [vmem:[#allocation6 + $0x28] sm:$0xff] }
  0x10   :  { %v58_v11 = vld [vmem:[#allocation6 + $0x20] sm:$0xff]  ;;  %v57_v12 = vld [vmem:[#allocation6 + $0x18] sm:$0xff]  ;;  %v56_v13 = vld [vmem:[#allocation6 + $0x10] sm:$0xff] }
  0x11   :  { %71 = vmatpush.xpose.msra.mxu0 %v68_v1  ;;  %125 = vmatpush.xpose.msra.mxu1 %v68_v1  ;;  %v55_v14 = vld [vmem:[#allocation6 + $0x8] sm:$0xff]  ;;  %v54_v15 = vld [vmem:[#allocation6] sm:$0xff]  ;;  %v52_v16 = vld [vmem:[#allocation3] sm:$0xff] }
  0x12   :  { %v53_v17 = vld [vmem:[#allocation3 + $0x8] sm:$0xff] }
  0x15   :  { %72 = vmatpush.xpose.msra.mxu0 %v67_v2  ;;  %126 = vmatpush.xpose.msra.mxu1 %v67_v2 }
  0x19   :  { %73 = vmatpush.xpose.msra.mxu0 %v66_v3  ;;  %127 = vmatpush.xpose.msra.mxu1 %v66_v3 }
  0x1d   :  { %74 = vmatpush.xpose.msra.mxu0 %v65_v4  ;;  %128 = vmatpush.xpose.msra.mxu1 %v65_v4 }
  0x21   :  { %75 = vmatpush.xpose.msra.mxu0 %v64_v5  ;;  %129 = vmatpush.xpose.msra.mxu1 %v64_v5 }
  0x25   :  { %76 = vmatpush.xpose.msra.mxu0 %v63_v6  ;;  %130 = vmatpush.xpose.msra.mxu1 %v63_v6 }
  0x29   :  { %77 = vmatpush.xpose.msra.mxu0 %v62_v7  ;;  %131 = vmatpush.xpose.msra.mxu1 %v62_v7 }
  0x2d   :  { %78 = vmatpush.xpose.msra.mxu0 %v61_v8  ;;  %132 = vmatpush.xpose.msra.mxu1 %v61_v8 }
  0x31   :  { %79 = vmatpush.xpose.msra.mxu0 %v60_v9  ;;  %133 = vmatpush.xpose.msra.mxu1 %v60_v9 }
  0x35   :  { %80 = vmatpush.xpose.msra.mxu0 %v59_v10  ;;  %134 = vmatpush.xpose.msra.mxu1 %v59_v10 }
  0x39   :  { %81 = vmatpush.xpose.msra.mxu0 %v58_v11  ;;  %135 = vmatpush.xpose.msra.mxu1 %v58_v11 }
  0x3d   :  { %82 = vmatpush.xpose.msra.mxu0 %v57_v12  ;;  %136 = vmatpush.xpose.msra.mxu1 %v57_v12 }
  0x41   :  { %83 = vmatpush.xpose.msra.mxu0 %v56_v13  ;;  %137 = vmatpush.xpose.msra.mxu1 %v56_v13 }
  0x45   :  { %84 = vmatpush.xpose.msra.mxu0 %v55_v14  ;;  %138 = vmatpush.xpose.msra.mxu1 %v55_v14 }
  0x49   :  { %85 = vmatpush.xpose.msra.mxu0 %v54_v15  ;;  %139 = vmatpush.xpose.msra.mxu1 %v54_v15 }
  0x4c   :  { %86 = vmatmul.f32.vlgmr.msra.gmra.mxu0 %v52_v16  ;;  %89 = vmatmul.f32.vlgmr.msra.gmra.mxu1 %v53_v17 }
  0xc9   :  { %v87_v18 = vpop.f32.mrf.mxu0  ;;  %v90_v19 = vpop.f32.mrf.mxu1 }
  0xca   :  { %102 = vst [vmem:[#allocation8] sm:$0xff] %v87_v18 }
  0xcb   :  { %103 = vst [vmem:[#allocation8 + $0x8] sm:$0xff] %v90_v19 }
  0xcc   :  { %116 = dma.vmem_to_hbm [thread:$0]  %s109_s1, 256, %s111_s23, [#allocation5], %s224_s17, %s224_s17, %s225_s18  }
  0xcd   :  { %221 = dma.done.wait [#allocation5], 256  }
  0xce   :  { %222 = vsyncadd [#allocation5], 4294967040 }
  0xcf   :  { %121 = vsyncpa [#allocation4], 1 }
  0xd0   :  { %122 = vsyncpa [#allocation7], 1 }
  0xd1   :  { %123 = vsyncpa [#allocation5], 1 }

</bundles_post_ra>
